<compile_context>
chip_gen: v7x
topology: tpu7x:2x2x1
jax: 0.10.0
libtpu: 0.0.40
codegen_flags: <defaults>
</compile_context>

<pallas_src>
import functools

import jax
import jax.numpy as jnp
from jax.experimental import pallas as pl
from jax.experimental.pallas import tpu as pltpu


# ---------------------------------------------------------------------------
# In-kernel exact (erf-based) GELU, matching torch.nn.GELU() default.
# erf evaluated with Abramowitz & Stegun 7.1.26 (|err| < 1.5e-7) so Mosaic
# only needs exp / mul / add (no reliance on a native erf lowering).
# ---------------------------------------------------------------------------
def _erf_approx(z):
    a1, a2, a3, a4, a5 = (0.254829592, -0.284496736, 1.421413741,
                          -1.453152027, 1.061405429)
    p = 0.3275911
    sgn = jnp.where(z >= 0.0, 1.0, -1.0)
    az = jnp.abs(z)
    t = 1.0 / (1.0 + p * az)
    poly = ((((a5 * t + a4) * t + a3) * t + a2) * t + a1) * t
    return sgn * (1.0 - poly * jnp.exp(-az * az))


def _gelu_exact(x):
    return 0.5 * x * (1.0 + _erf_approx(x * 0.7071067811865476))


# ---------------------------------------------------------------------------
# Fused FFN kernel: one row-tile of the flattened (B*L, d_in) activations.
# ---------------------------------------------------------------------------
def _pff_kernel(x_ref, w1_ref, w2_ref, vec_ref, out_ref, *, d_in, d_hid, eps):
    x = x_ref[...]                                   # (bm, d_in) f32  (residual)

    b1 = vec_ref[0:1, :d_hid]                        # (1, d_hid)
    b2 = vec_ref[1:2, :d_in]                         # (1, d_in)
    gamma = vec_ref[2:3, :d_in]                      # (1, d_in)
    beta = vec_ref[3:4, :d_in]                       # (1, d_in)

    # fc_1: bf16 MXU matmul, f32 accumulation
    h = jnp.dot(x.astype(jnp.bfloat16), w1_ref[...],
                preferred_element_type=jnp.float32) + b1

    # GELU (exact, erf-based)
    h = _gelu_exact(h)

    # fc_2: bf16 MXU matmul, f32 accumulation
    y = jnp.dot(h.astype(jnp.bfloat16), w2_ref[...],
                preferred_element_type=jnp.float32) + b2

    # dropout(p=0.1) is identity in eval mode
    y = y + x                                        # residual

    # LayerNorm(d_in, eps=1e-12), one-pass statistics
    inv_d = 1.0 / d_in
    mean = jnp.sum(y, axis=-1, keepdims=True) * inv_d
    mean_sq = jnp.sum(y * y, axis=-1, keepdims=True) * inv_d
    var = mean_sq - mean * mean
    y = (y - mean) * jax.lax.rsqrt(var + eps)
    out_ref[...] = (y * gamma + beta).astype(out_ref.dtype)


def _pick_block_m(m_rows):
    """Largest sublane-aligned row tile that gives >= 2 grid steps."""
    for bm in (512, 256, 128, 64, 32, 16, 8):
        if m_rows >= 2 * bm:
            return bm
    return max(8, -(-m_rows // 8) * 8)               # single (padded) tile


def tensor_pff_forward(x, w1, b1, w2, b2, gamma, beta, *, eps=1e-12,
                       block_m=None):
    """Fused Tensor_PFF forward.  x: (..., d_in); w1: (d_in, d_hid); w2: (d_hid, d_in)."""
    orig_shape = x.shape
    d_in = orig_shape[-1]
    d_hid = w1.shape[1]
    assert w1.shape == (d_in, d_hid) and w2.shape == (d_hid, d_in)

    x2 = x.reshape(-1, d_in)
    m_rows = x2.shape[0]
    if block_m is None:
        block_m = _pick_block_m(m_rows)

    # Pad rows to a multiple of the tile (padded rows are computed and dropped).
    m_pad = pl.cdiv(m_rows, block_m) * block_m
    if m_pad != m_rows:
        x2 = jnp.pad(x2, ((0, m_pad - m_rows), (0, 0)))
    grid = (m_pad // block_m,)

    # Pack the 4 small vectors into one (4, Dmax) array -> single DMA.
    d_max = max(d_in, d_hid)
    vecs = jnp.zeros((4, d_max), jnp.float32)
    vecs = vecs.at[0, :d_hid].set(b1.astype(jnp.float32))
    vecs = vecs.at[1, :d_in].set(b2.astype(jnp.float32))
    vecs = vecs.at[2, :d_in].set(gamma.astype(jnp.float32))
    vecs = vecs.at[3, :d_in].set(beta.astype(jnp.float32))

    # bf16 weights for the MXU (halves weight HBM traffic; f32 accumulation).
    w1_bf = w1.astype(jnp.bfloat16)
    w2_bf = w2.astype(jnp.bfloat16)

    kernel = functools.partial(_pff_kernel, d_in=d_in, d_hid=d_hid, eps=eps)

    grid_spec = pltpu.PrefetchScalarGridSpec(
        num_scalar_prefetch=0,
        grid=grid,
        in_specs=[
            pl.BlockSpec((block_m, d_in), lambda i: (i, 0)),      # activations
            pl.BlockSpec((d_in, d_hid), lambda i: (0, 0)),        # W1 (resident)
            pl.BlockSpec((d_hid, d_in), lambda i: (0, 0)),        # W2 (resident)
            pl.BlockSpec((4, d_max), lambda i: (0, 0)),           # packed vectors
        ],
        out_specs=pl.BlockSpec((block_m, d_in), lambda i: (i, 0)),
    )

    flops = 4 * m_pad * d_in * d_hid                  # two matmuls
    transcendentals = m_pad * (d_hid + d_in)          # exp (GELU) + rsqrt (LN)
    bytes_accessed = (x2.size * 4 + w1_bf.size * 2 + w2_bf.size * 2
                      + vecs.size * 4 + m_pad * d_in * 4)

    out = pl.pallas_call(
        kernel,
        grid_spec=grid_spec,
        out_shape=jax.ShapeDtypeStruct((m_pad, d_in), x.dtype),
        compiler_params=pltpu.CompilerParams(
            dimension_semantics=("parallel",),
            vmem_limit_bytes=32 * 1024 * 1024,
        ),
        cost_estimate=pl.CostEstimate(
            flops=flops, transcendentals=transcendentals,
            bytes_accessed=bytes_accessed),
    )(x2, w1_bf, w2_bf, vecs)

    return out[:m_rows].reshape(orig_shape)


# ---------------------------------------------------------------------------
# Host-side helper: contract TT-matrix cores (r_{i-1}, m_i, n_i, r_i) into a
# dense (prod m, prod n) weight, mirroring what TTM_Linear_module computes.
# ---------------------------------------------------------------------------
def tt_matrix_to_dense(cores):
    full = cores[0]
    for c in cores[1:]:
        full = jnp.tensordot(full, c, axes=[[-1], [0]])
    full = jnp.squeeze(full, axis=(0, -1))            # (m1, n1, m2, n2, ...)
    k = len(cores)
    perm = [2 * i for i in range(k)] + [2 * i + 1 for i in range(k)]
    full = full.transpose(perm)                       # (m1..mk, n1..nk)
    m = 1
    n = 1
    for c in cores:
        m *= c.shape[1]
        n *= c.shape[2]
    return full.reshape(m, n)


# ---------------------------------------------------------------------------
# Pure-JAX reference mirroring the PyTorch forward (eval mode, f32).
# ---------------------------------------------------------------------------
def _reference(x, w1, b1, w2, b2, gamma, beta, eps=1e-12):
    h = x @ w1 + b1
    h = jax.nn.gelu(h, approximate=False)             # nn.GELU() default (erf)
    y = h @ w2 + b2                                   # dropout identity in eval
    y = y + x
    mean = jnp.mean(y, axis=-1, keepdims=True)
    var = jnp.mean((y - mean) ** 2, axis=-1, keepdims=True)
    return (y - mean) / jnp.sqrt(var + eps) * gamma + beta


if __name__ == "__main__":
    # Small but lane-aligned shapes consistent with the module: (batch, seq, d_in)
    # with TT factorizations d_in=128 -> (8,16) and d_hid=256 -> (16,16), rank 8.
    B, L, d_in, d_hid, tt_rank = 2, 8, 128, 256, 8

    key = jax.random.PRNGKey(0)
    ks = jax.random.split(key, 10)
    c = 0.3  # TT-core init scale

    fc1_cores = [
        jax.random.uniform(ks[0], (1, 8, 16, tt_rank), jnp.float32, -c, c),
        jax.random.uniform(ks[1], (tt_rank, 16, 16, 1), jnp.float32, -c, c),
    ]
    fc2_cores = [
        jax.random.uniform(ks[2], (1, 16, 8, tt_rank), jnp.float32, -c, c),
        jax.random.uniform(ks[3], (tt_rank, 16, 16, 1), jnp.float32, -c, c),
    ]
    w1 = tt_matrix_to_dense(fc1_cores)                # (128, 256)
    w2 = tt_matrix_to_dense(fc2_cores)                # (256, 128)
    b1 = jax.random.uniform(ks[4], (d_hid,), jnp.float32, -0.1, 0.1)
    b2 = jax.random.uniform(ks[5], (d_in,), jnp.float32, -0.1, 0.1)
    gamma = 1.0 + 0.1 * jax.random.normal(ks[6], (d_in,), jnp.float32)
    beta = 0.1 * jax.random.normal(ks[7], (d_in,), jnp.float32)

    x = jax.random.normal(ks[8], (B, L, d_in), jnp.float32)

    out = tensor_pff_forward(x, w1, b1, w2, b2, gamma, beta, eps=1e-12)
    jax.block_until_ready(out)

    ref = _reference(x, w1, b1, w2, b2, gamma, beta, eps=1e-12)
    # bf16 MXU operands (f32 accumulation) vs f32 reference -> relaxed tolerance.
    assert out.shape == ref.shape
    assert jnp.allclose(out, ref, atol=3e-2, rtol=3e-2), (
        float(jnp.max(jnp.abs(out - ref))))

    print("KERNEL_OK")
</pallas_src>

<mosaic_0001>
module attributes {stable_mosaic.version = 11 : i64} {
  func.func @_pff_kernel(%arg0: i32, %arg1: memref<8x128xf32, #tpu.memory_space<vmem>>, %arg2: memref<128x256xbf16, #tpu.memory_space<vmem>>, %arg3: memref<256x128xbf16, #tpu.memory_space<vmem>>, %arg4: memref<4x256xf32, #tpu.memory_space<vmem>>, %arg5: memref<8x128xf32, #tpu.memory_space<vmem>>) attributes {dimension_semantics = [#tpu.dimension_semantics<parallel>], iteration_bounds = array<i64: 2>, scalar_prefetch = 0 : i64, scratch_operands = 0 : i64, tpu.core_type = #tpu.core_type<tc>, window_params = [{transform_indices = @transform_0, window_bounds = array<i64: 8, 128>}, {pipeline_mode = #tpu.pipeline_mode<synchronous>, transform_indices = @transform_1, window_bounds = array<i64: 128, 256>}, {pipeline_mode = #tpu.pipeline_mode<synchronous>, transform_indices = @transform_2, window_bounds = array<i64: 256, 128>}, {pipeline_mode = #tpu.pipeline_mode<synchronous>, transform_indices = @transform_3, window_bounds = array<i64: 4, 256>}, {transform_indices = @transform_4, window_bounds = array<i64: 8, 128>}]} {
    %c0 = arith.constant 0 : index
    %c0_0 = arith.constant 0 : index
    %0 = vector.load %arg1[%c0, %c0_0] : memref<8x128xf32, #tpu.memory_space<vmem>>, vector<8x128xf32>
    %c0_1 = arith.constant 0 : index
    %c0_2 = arith.constant 0 : index
    %1 = vector.load %arg4[%c0_1, %c0_2] : memref<4x256xf32, #tpu.memory_space<vmem>>, vector<1x256xf32>
    %c1 = arith.constant 1 : index
    %c0_3 = arith.constant 0 : index
    %2 = vector.load %arg4[%c1, %c0_3] : memref<4x256xf32, #tpu.memory_space<vmem>>, vector<1x128xf32>
    %c2 = arith.constant 2 : index
    %c0_4 = arith.constant 0 : index
    %3 = vector.load %arg4[%c2, %c0_4] : memref<4x256xf32, #tpu.memory_space<vmem>>, vector<1x128xf32>
    %c3 = arith.constant 3 : index
    %c0_5 = arith.constant 0 : index
    %4 = vector.load %arg4[%c3, %c0_5] : memref<4x256xf32, #tpu.memory_space<vmem>>, vector<1x128xf32>
    %5 = arith.truncf %0 : vector<8x128xf32> to vector<8x128xbf16>
    %c0_6 = arith.constant 0 : index
    %c0_7 = arith.constant 0 : index
    %6 = vector.load %arg2[%c0_6, %c0_7] : memref<128x256xbf16, #tpu.memory_space<vmem>>, vector<128x256xbf16>
    %cst = arith.constant dense<0.000000e+00> : vector<8x256xf32>
    %7 = tpu.matmul %5, %6, %cst {dimension_numbers = #tpu.dot_dimension_numbers<[1], [0], [0], [1], [0, 0, 1, 1], [], []>} : vector<8x128xbf16>, vector<128x256xbf16>, vector<8x256xf32> -> vector<8x256xf32>
    %8 = vector.broadcast %1 : vector<1x256xf32> to vector<8x256xf32>
    %9 = arith.addf %7, %8 : vector<8x256xf32>
    %cst_8 = arith.constant 5.000000e-01 : f32
    %10 = vector.broadcast %cst_8 : f32 to vector<8x256xf32>
    %11 = arith.mulf %10, %9 : vector<8x256xf32>
    %cst_9 = arith.constant 0.707106769 : f32
    %12 = vector.broadcast %cst_9 : f32 to vector<8x256xf32>
    %13 = arith.mulf %9, %12 : vector<8x256xf32>
    %cst_10 = arith.constant 0.000000e+00 : f32
    %14 = vector.broadcast %cst_10 : f32 to vector<8x256xf32>
    %15 = arith.cmpf oge, %13, %14 : vector<8x256xf32>
    %cst_11 = arith.constant 1.000000e+00 : f32
    %cst_12 = arith.constant -1.000000e+00 : f32
    %16 = vector.broadcast %cst_11 : f32 to vector<8x256xf32>
    %17 = vector.broadcast %cst_12 : f32 to vector<8x256xf32>
    %18 = arith.select %15, %16, %17 : vector<8x256xi1>, vector<8x256xf32>
    %19 = math.absf %13 : vector<8x256xf32>
    %cst_13 = arith.constant 0.327591091 : f32
    %20 = vector.broadcast %cst_13 : f32 to vector<8x256xf32>
    %21 = arith.mulf %20, %19 : vector<8x256xf32>
    %cst_14 = arith.constant 1.000000e+00 : f32
    %22 = vector.broadcast %cst_14 : f32 to vector<8x256xf32>
    %23 = arith.addf %22, %21 : vector<8x256xf32>
    %cst_15 = arith.constant 1.000000e+00 : f32
    %24 = vector.broadcast %cst_15 : f32 to vector<8x256xf32>
    %25 = arith.divf %24, %23 : vector<8x256xf32>
    %cst_16 = arith.constant 1.06140542 : f32
    %26 = vector.broadcast %cst_16 : f32 to vector<8x256xf32>
    %27 = arith.mulf %26, %25 : vector<8x256xf32>
    %cst_17 = arith.constant -1.45315206 : f32
    %28 = vector.broadcast %cst_17 : f32 to vector<8x256xf32>
    %29 = arith.addf %27, %28 : vector<8x256xf32>
    %30 = arith.mulf %29, %25 : vector<8x256xf32>
    %cst_18 = arith.constant 1.42141378 : f32
    %31 = vector.broadcast %cst_18 : f32 to vector<8x256xf32>
    %32 = arith.addf %30, %31 : vector<8x256xf32>
    %33 = arith.mulf %32, %25 : vector<8x256xf32>
    %cst_19 = arith.constant -0.284496725 : f32
    %34 = vector.broadcast %cst_19 : f32 to vector<8x256xf32>
    %35 = arith.addf %33, %34 : vector<8x256xf32>
    %36 = arith.mulf %35, %25 : vector<8x256xf32>
    %cst_20 = arith.constant 0.254829586 : f32
    %37 = vector.broadcast %cst_20 : f32 to vector<8x256xf32>
    %38 = arith.addf %36, %37 : vector<8x256xf32>
    %39 = arith.mulf %38, %25 : vector<8x256xf32>
    %cst_21 = arith.constant 0.000000e+00 : f32
    %40 = vector.broadcast %cst_21 : f32 to vector<8x256xf32>
    %41 = arith.subf %40, %19 : vector<8x256xf32>
    %42 = arith.mulf %41, %19 : vector<8x256xf32>
    %43 = math.exp %42 : vector<8x256xf32>
    %44 = arith.mulf %39, %43 : vector<8x256xf32>
    %cst_22 = arith.constant 1.000000e+00 : f32
    %45 = vector.broadcast %cst_22 : f32 to vector<8x256xf32>
    %46 = arith.subf %45, %44 : vector<8x256xf32>
    %47 = arith.mulf %18, %46 : vector<8x256xf32>
    %cst_23 = arith.constant 1.000000e+00 : f32
    %48 = vector.broadcast %cst_23 : f32 to vector<8x256xf32>
    %49 = arith.addf %48, %47 : vector<8x256xf32>
    %50 = arith.mulf %11, %49 : vector<8x256xf32>
    %51 = arith.truncf %50 : vector<8x256xf32> to vector<8x256xbf16>
    %c0_24 = arith.constant 0 : index
    %c0_25 = arith.constant 0 : index
    %52 = vector.load %arg3[%c0_24, %c0_25] : memref<256x128xbf16, #tpu.memory_space<vmem>>, vector<256x128xbf16>
    %cst_26 = arith.constant dense<0.000000e+00> : vector<8x128xf32>
    %53 = tpu.matmul %51, %52, %cst_26 {dimension_numbers = #tpu.dot_dimension_numbers<[1], [0], [0], [1], [0, 0, 1, 1], [], []>} : vector<8x256xbf16>, vector<256x128xbf16>, vector<8x128xf32> -> vector<8x128xf32>
    %54 = vector.broadcast %2 : vector<1x128xf32> to vector<8x128xf32>
    %55 = arith.addf %53, %54 : vector<8x128xf32>
    %56 = arith.addf %55, %0 : vector<8x128xf32>
    %cst_27 = arith.constant dense<0.000000e+00> : vector<8xf32>
    %57 = vector.multi_reduction <add>, %56, %cst_27 [1] : vector<8x128xf32> to vector<8xf32>
    %58 = vector.shape_cast %57 : vector<8xf32> to vector<8x1xf32>
    %cst_28 = arith.constant 7.812500e-03 : f32
    %59 = vector.broadcast %cst_28 : f32 to vector<8x1xf32>
    %60 = arith.mulf %58, %59 : vector<8x1xf32>
    %61 = arith.mulf %56, %56 : vector<8x128xf32>
    %cst_29 = arith.constant dense<0.000000e+00> : vector<8xf32>
    %62 = vector.multi_reduction <add>, %61, %cst_29 [1] : vector<8x128xf32> to vector<8xf32>
    %63 = vector.shape_cast %62 : vector<8xf32> to vector<8x1xf32>
    %cst_30 = arith.constant 7.812500e-03 : f32
    %64 = vector.broadcast %cst_30 : f32 to vector<8x1xf32>
    %65 = arith.mulf %63, %64 : vector<8x1xf32>
    %66 = arith.mulf %60, %60 : vector<8x1xf32>
    %67 = arith.subf %65, %66 : vector<8x1xf32>
    %68 = vector.broadcast %60 : vector<8x1xf32> to vector<8x128xf32>
    %69 = arith.subf %56, %68 : vector<8x128xf32>
    %cst_31 = arith.constant 9.99999996E-13 : f32
    %70 = vector.broadcast %cst_31 : f32 to vector<8x1xf32>
    %71 = arith.addf %67, %70 : vector<8x1xf32>
    %72 = math.rsqrt %71 : vector<8x1xf32>
    %73 = vector.broadcast %72 : vector<8x1xf32> to vector<8x128xf32>
    %74 = arith.mulf %69, %73 : vector<8x128xf32>
    %75 = vector.broadcast %3 : vector<1x128xf32> to vector<8x128xf32>
    %76 = arith.mulf %74, %75 : vector<8x128xf32>
    %77 = vector.broadcast %4 : vector<1x128xf32> to vector<8x128xf32>
    %78 = arith.addf %76, %77 : vector<8x128xf32>
    %c0_32 = arith.constant 0 : index
    %c0_33 = arith.constant 0 : index
    %79 = vector.load %arg5[%c0_32, %c0_33] : memref<8x128xf32, #tpu.memory_space<vmem>>, vector<8x128xf32>
    tpu.vector_store %arg5[%c0_32, %c0_33], %78 {strides = array<i32>} : memref<8x128xf32, #tpu.memory_space<vmem>>, vector<8x128xf32>,
    return
  }
  func.func @transform_0(%arg0: i32) -> (i32, i32) {
    %c0_i32 = arith.constant 0 : i32
    %c0_i32_0 = arith.constant 0 : i32
    return %arg0, %c0_i32 : i32, i32
  }
  func.func @transform_1(%arg0: i32) -> (i32, i32) {
    %c0_i32 = arith.constant 0 : i32
    %c0_i32_0 = arith.constant 0 : i32
    %c0_i32_1 = arith.constant 0 : i32
    return %c0_i32, %c0_i32_0 : i32, i32
  }
  func.func @transform_2(%arg0: i32) -> (i32, i32) {
    %c0_i32 = arith.constant 0 : i32
    %c0_i32_0 = arith.constant 0 : i32
    %c0_i32_1 = arith.constant 0 : i32
    return %c0_i32, %c0_i32_0 : i32, i32
  }
  func.func @transform_3(%arg0: i32) -> (i32, i32) {
    %c0_i32 = arith.constant 0 : i32
    %c0_i32_0 = arith.constant 0 : i32
    %c0_i32_1 = arith.constant 0 : i32
    return %c0_i32, %c0_i32_0 : i32, i32
  }
  func.func @transform_4(%arg0: i32) -> (i32, i32) {
    %c0_i32 = arith.constant 0 : i32
    %c0_i32_0 = arith.constant 0 : i32
    return %arg0, %c0_i32 : i32, i32
  }
}

</mosaic_0001>

<bundles_post_ra>
// kernel: tpu_custom_call.1
= control target key start
LH: loop header
LB: loop body
LE: loop exit
PB: predicated region body
PF: predicated region fallthrough
CT: control target
= control target key end

     0   :  { %9 = vsyncpa [#allocation3], 0  ;;  %s1395_s0 = inlined_call_operand.hbm [shape: f32[16,128], index: 0, kind: input, shape index: {}]   ;;  %s1396_s1 = inlined_call_operand.hbm [shape: bf16[128,256], index: 1, kind: input, shape index: {}]   ;;  %s1397_s2 = inlined_call_operand.hbm [shape: bf16[256,128], index: 2, kind: input, shape index: {}]   ;;  %s1398_s3 = inlined_call_operand.vmem [shape: f32[4,256], index: 3, kind: input, shape index: {}]   ;;  %s1399_s4 = inlined_call_operand.hbm [shape: f32[16,128], index: 4, kind: output, shape index: {}]  }
   0x1   :  { %11 = vsyncpa [#allocation3 + $0x1], 0 }
   0x2   :  { %12 = vsyncpa [#allocation6], 0 }
   0x3   :  { %13 = vsyncpa [#allocation4], 0 }
   0x4   :  { %15 = vsyncpa [#allocation4 + $0x1], 0  ;;  %s1142_s15 = smov 0   ;;  %s1144_s16 = smov 0  }
   0x5   :  { %s1146_s17 = smov 0   ;;  %s1148_s18 = smov 0  }
   0x6 LB: > { %s1163_s19 = sadd.s32 4294967295, %s1105_s18   ;;  %s753_s20 = sadd.s32 4294967294, %s1105_s18   ;;  %s1105_s18 = sphi %s1148_s18, %s1419_s18   ;;  %s1101_s17 = sphi %s1146_s17, %s1418_s17   ;;  %s1097_s16 = sphi %s1144_s16, %s1417_s16   ;;  %s1093_s15 = sphi %s1142_s15, %s1416_s15  }
   0x7   : > { %p41_p0 = scmp.ne.s32.totalorder %s1097_s16, %s1093_s15  ;;  %p1400_p1 = scmp.eq.s32.totalorder %s1163_s19, 0 }
   0x8   : > { %p134_p3 = scmp.eq.s32.totalorder %s753_s20, 1  ;;  %p754_p5 = scmp.ge.s32.totalorder %s1105_s18, 1 }
   0x9   : > { %p1172_p4 = por %p1400_p1, %p41_p0  ;;  %p141_p7 = scmp.lt.s32.totalorder %s1105_s18, 3 }
   0xa   : > { %p1177_p6 = por %p134_p3, %p41_p0  ;;  %s1107_s24 = smov [#allocation5]  }
   0xb   : > { %s1403_s21 = scalar_select %p1172_p4, 1, 0 }
   0xc   : > { %s1404_s22 = scalar_select %p1177_p6, 1, 0 }
   0xd   : > { %p1182_p8 = pnand %p754_p5, %p141_p7  ;;  %s153_s25 = sshll.u32 %s1107_s24, 4  ;;  %s1186_s25 = int_to_ptr.vmem [resolvable:$true] %s153_s25 }
   0xe   : > { %s1108_s27 = smov [#allocation7]   ;;  %s949_s5 = scalar_lea.hbm %s1396_s1, 2048 }
   0xf   : > { %p838_p9 = pneg %p1182_p8  ;;  %s166_s28 = sshll.u32 %s1108_s27, 4  ;;  %s1197_s28 = int_to_ptr.vmem [resolvable:$true] %s166_s28 }
  0x10   : > { %p950_p12 = scmp.ne.s32.totalorder %s1396_s1, %s949_s5  ;;  %p956_p5 = scmp.lt.u32.totalorder %s949_s5, %s1396_s1 }
  0x11   : > { %p1193_p11 = pnand %p838_p9, %p1400_p1 }
  0x13   : > { %p951_p13 = pneg %p1193_p11 }
  0x15   : > { %p952_p0 = pnand %p951_p13, %p950_p12 }
  0x17   : > { %p953_p3 = pneg %p952_p0 }
  0x19   : > { %p958_p7 = pnand %p956_p5, %p953_p3 }
  0x1b   : > { %961 = shalt.err (!%p958_p7)
}
  0x1c   : > { %s962_s10 = scalar_lea.vmem %s1186_s25, 2048  ;;  %p970_p2 = scmp.lt.s32.totalorder %s1186_s25, %s1186_s25 }
  0x1d   : > { %p963_p9 = scmp.ne.s32.totalorder %s1186_s25, %s962_s10  ;;  %p971_p12 = scmp.lt.s32.totalorder %s962_s10, %s962_s10 }
  0x1f   : > { %p965_p10 = pnand %p963_p9, %p951_p13  ;;  %p972_p0 = por %p971_p12, %p970_p2 }
  0x21   : > { %p966_p1 = pneg %p965_p10 }
  0x23   : > { %p973_p6 = pnand %p972_p0, %p966_p1 }
  0x25   : > { %976 = shalt.err (!%p973_p6)
}
  0x26   : > { %s1109_s11 = smov 128   ;;  %s1110_s12 = smov 8  }
  0x27   : > { %841 = dma.hbm_to_vmem [thread:$0]  (!%p1193_p11), %s1396_s1, 2048, %s1186_s25, [#allocation6], %s1109_s11, %s1109_s11, %s1110_s12  }
  0x28   : > { %s977_s27 = scalar_lea.hbm %s1397_s2, 2048 }
  0x29   : > { %p978_p2 = scmp.ne.s32.totalorder %s1397_s2, %s977_s27  ;;  %p984_p10 = scmp.lt.u32.totalorder %s977_s27, %s1397_s2 }
  0x2b   : > { %p980_p1 = pnand %p978_p2, %p951_p13 }
  0x2d   : > { %p981_p6 = pneg %p980_p1 }
  0x2f   : > { %p986_p3 = pnand %p984_p10, %p981_p6 }
  0x31   : > { %989 = shalt.err (!%p986_p3)
}
  0x32   : > { %s990_s25 = scalar_lea.vmem %s1197_s28, 2048  ;;  %p998_p12 = scmp.lt.s32.totalorder %s1197_s28, %s1197_s28 }
  0x33   : > { %p991_p5 = scmp.ne.s32.totalorder %s1197_s28, %s990_s25  ;;  %p999_p0 = scmp.lt.s32.totalorder %s990_s25, %s990_s25 }
  0x35   : > { %p993_p7 = pnand %p991_p5, %p951_p13  ;;  %p1000_p2 = por %p999_p0, %p998_p12 }
  0x37   : > { %p994_p9 = pneg %p993_p7 }
  0x39   : > { %p1001_p1 = pnand %p1000_p2, %p994_p9 }
  0x3b   : > { %1004 = shalt.err (!%p1001_p1)
}
  0x3c   : > { %s1111_s7 = smov 64   ;;  %s1112_s8 = smov 4  }
  0x3d   : > { %844 = dma.hbm_to_vmem [thread:$0]  (!%p1193_p11), %s1397_s2, 2048, %s1197_s28, [#allocation6], %s1111_s7, %s1111_s7, %s1112_s8  }
  0x3e   : > { %s1252_s11 = sadd.s32 1, %s1105_s18   ;;  %s28_s13 = sadd.s32 1, %s1101_s17 }
  0x3f   : > { %s25_s12 = ssub.s32 %s1105_s18, %s1252_s11  ;;  %p35_p6 = scmp.ne.s32.totalorder %s1101_s17, %s1097_s16 }
  0x40   : > { %p26_p13 = scmp.eq.s32.totalorder %s25_s12, 0  ;;  %p36_p10 = scmp.eq.s32.totalorder %s1105_s18, 0 }
  0x41   : > { %p1407_p5 = scmp.eq.s32.totalorder %s1163_s19, 1  ;;  %p855_p9 = scmp.lt.s32.totalorder %s1105_s18, 2 }
  0x42   : > { %s1261_s14 = scalar_select %p26_p13, %s1101_s17, %s28_s13  }
  0x43   : > { %p37_p3 = por %p36_p10, %p35_p6  ;;  %p1265_p7 = por %p1407_p5, %p35_p6 }
  0x44   : > { %s183_s26 = sand.u32 1, %s1101_s17   ;;  %s759_s28 = sshll.u32 %s1105_s18, 7 }
  0x45   : > { %s1408_s20 = scalar_select %p1265_p7, 1, 0 }
  0x46   : > { %s758_s24 = sshll.u32 %s183_s26, 3  ;;  %s1275_s30 = scalar_lea.hbm %s1395_s0, %s759_s28 }
  0x47   : > { %s187_s5 = scalar_lea.vmem [#allocation2], %s758_s24  ;;  %p1279_p11 = pnand %p855_p9, %p37_p3 }
  0x48   : > { %s194_s6 = sshll.u32 %s187_s5, 4  ;;  %s184_s7 = scalar_lea.sflag [#allocation3], %s183_s26  ;;  %s1277_s6 = int_to_ptr.vmem [resolvable:$true] %s194_s6 }
  0x49   : > { %s1005_s8 = scalar_lea.hbm %s1275_s30, 128  ;;  %p1007_p0 = pneg %p1279_p11 }
  0x4a   : > { %p1006_p12 = scmp.ne.s32.totalorder %s1275_s30, %s1005_s8  ;;  %s1010_s12 = scalar_lea.hbm %s1395_s0, 256 }
  0x4b   : > { %p1011_p13 = scmp.lt.u32.totalorder %s1275_s30, %s1395_s0  ;;  %p1012_p6 = scmp.lt.u32.totalorder %s1010_s12, %s1005_s8 }
  0x4c   : > { %p1008_p2 = pnand %p1007_p0, %p1006_p12  ;;  %p1014_p3 = scmp.lt.u32.totalorder %s1005_s8, %s1275_s30 }
  0x4d   : > { %p1013_p10 = por %p1012_p6, %p1011_p13 }
  0x4e   : > { %p1009_p1 = pneg %p1008_p2 }
  0x4f   : > { %p1015_p5 = por %p1014_p3, %p1013_p10 }
  0x51   : > { %p1016_p9 = pnand %p1015_p5, %p1009_p1 }
  0x53   : > { %1019 = shalt.err (!%p1016_p9)
}
  0x54   : > { %s1020_s26 = scalar_lea.vmem %s1277_s6, 128  ;;  %s1113_s28 = smov [#allocation2]  }
  0x55   : > { %p1021_p12 = scmp.ne.s32.totalorder %s1277_s6, %s1020_s26  ;;  %s1025_s27 = sshll.u32 %s1113_s28, 4  ;;  %s1026_s27 = int_to_ptr.vmem [resolvable:$false] %s1025_s27 }
  0x56   : > { %s1027_s29 = scalar_lea.vmem %s1026_s27, 256  ;;  %p1028_p4 = scmp.lt.s32.totalorder %s1277_s6, %s1026_s27 }
  0x57   : > { %p1023_p2 = pnand %p1021_p12, %p1007_p0  ;;  %p1029_p13 = scmp.lt.s32.totalorder %s1027_s29, %s1020_s26 }
  0x59   : > { %p1024_p7 = pneg %p1023_p2  ;;  %p1030_p6 = por %p1029_p13, %p1028_p4 }
  0x5b   : > { %p1031_p10 = pnand %p1030_p6, %p1024_p7 }
  0x5d   : > { %1034 = shalt.err (!%p1031_p10)
}
  0x5e   : > { %848 = dma.hbm_to_vmem [thread:$0]  (!%p1279_p11), %s1275_s30, 128, %s1277_s6, %s184_s7  }
  0x5f   : > { %203 = sbr.rel (%p1182_p8) target bundleno = 806 (0x326), region = 36  ;;  %s1311_s5 = sand.u32 (!%p1182_p8), 1, %s1097_s16  }
  0x60   : > { %s761_s8 = sshll.u32 (!%p1182_p8), %s1311_s5, 3  ;;  %s206_s9 = scalar_lea.sflag (!%p1182_p8), [#allocation3], %s1311_s5 }
  0x61   : > { %s1317_s10 = scalar_lea.vmem (!%p1182_p8), [#allocation2], %s761_s8  ;;  %p1410_p4 = scmp.ne.s32.totalorder (!%p1182_p8), %s1403_s21, 0 }
  0x66   : > { %1080 = dma.done.wait (%p1410_p4), %s206_s9, 128  }
  0x67   : > { %1082 = vsyncadd (%p1410_p4), %s206_s9, 4294967168  ;;  %p1411_p7 = scmp.eq.s32.totalorder %s1163_s19, 0 }
  0x69   : > { %1084 = dma.done.wait (%p1411_p7), [#allocation6], 4096   ;;  %p1412_p8 = pmov %p1411_p7 }
  0x6a   : > { %v1114_v0 = vmov 0   ;;  %v899_v1 = vld [vmem:[#allocation5 + $0x4] ss:$8 sps:$4 sm:$0xff]   ;;  %v901_v2 = vld [vmem:[#allocation5] ss:$8 sps:$4 sm:$0xff]   ;;  %v1328_v17 = vld [vmem:[%s1317_s10] sm:$0xff]  ;;  %v266_v35 = vlaneseq }
  0x6b   : > { %1086 = vsyncadd (%p1412_p8), [#allocation6], 4294963200  ;;  %388 = vmatprep.mubr.bf16.mxu0 %v1114_v0  ;;  %356 = vmatprep.subr.bf16.mxu0 %v899_v1  ;;  %v902_v3 = vld [vmem:[#allocation5 + $0x14] ss:$8 sps:$4 sm:$0xff]   ;;  %v904_v4 = vld [vmem:[#allocation5 + $0x10] ss:$8 sps:$4 sm:$0xff]   ;;  %v248_v18 = vpack.c.bf16 %v1328_v17, %v1328_v17 }
  0x6c   : > { %357 = vmatpush1.bf16.msra.mxu0 %v901_v2  ;;  %v905_v5 = vld [vmem:[#allocation5 + $0x24] ss:$8 sps:$4 sm:$0xff]   ;;  %v907_v6 = vld [vmem:[#allocation5 + $0x20] ss:$8 sps:$4 sm:$0xff]   ;;  %v908_v7 = vld [vmem:[#allocation5 + $0x34] ss:$8 sps:$4 sm:$0xff]  }
  0x6d   : > { %358 = vmatprep.subr.bf16.mxu0 %v902_v3  ;;  %v910_v8 = vld [vmem:[#allocation5 + $0x30] ss:$8 sps:$4 sm:$0xff]   ;;  %v911_v9 = vld [vmem:[#allocation5 + $0x44] ss:$8 sps:$4 sm:$0xff]   ;;  %v913_v10 = vld [vmem:[#allocation5 + $0x40] ss:$8 sps:$4 sm:$0xff]  }
  0x6e   : > { %v914_v11 = vld [vmem:[#allocation5 + $0x54] ss:$8 sps:$4 sm:$0xff]   ;;  %v916_v12 = vld [vmem:[#allocation5 + $0x50] ss:$8 sps:$4 sm:$0xff]   ;;  %v917_v13 = vld [vmem:[#allocation5 + $0x64] ss:$8 sps:$4 sm:$0xff]  }
  0x6f   : > { %v919_v14 = vld [vmem:[#allocation5 + $0x60] ss:$8 sps:$4 sm:$0xff]   ;;  %v920_v15 = vld [vmem:[#allocation5 + $0x74] ss:$8 sps:$4 sm:$0xff]   ;;  %v922_v16 = vld [vmem:[#allocation5 + $0x70] ss:$8 sps:$4 sm:$0xff]  }
  0x70   : > { %359 = vmatpush1.bf16.msra.mxu0 %v904_v4  ;;  %v923_v19 = vld [vmem:[#allocation7 + $0x40] sm:$0xff]   ;;  %v925_v21 = vld [vmem:[#allocation7 + $0x48] sm:$0xff]   ;;  %v927_v23 = vld [vmem:[#allocation7 + $0x50] sm:$0xff]   ;;  %v267_v36 = vshrl.u32 %v266_v35, 7  ;;  %s801_s24 = sshll.u32 %s1163_s19, 7  ;;  %s241_s26 = scalar_lea.vmem [#allocation8], %s761_s8 }
  0x71   : > { %360 = vmatprep.subr.bf16.mxu0 %v905_v5  ;;  %v924_v20 = vld [vmem:[#allocation7] sm:$0xff]   ;;  %804 = vmatprep.subr.bf16.mxu1 %v923_v19  ;;  %v926_v22 = vld [vmem:[#allocation7 + $0x8] sm:$0xff]   ;;  %v928_v24 = vld [vmem:[#allocation7 + $0x10] sm:$0xff]   ;;  %s664_s28 = sshll.u32 %s241_s26, 4  ;;  %s1351_s9 = scalar_lea.hbm %s1399_s4, %s801_s24  ;;  %s1353_s28 = int_to_ptr.vmem [resolvable:$true] %s664_s28 }
  0x72   : > { %805 = vmatpush3.bf16.msra.mxu1 %v924_v20  ;;  %v929_v25 = vld [vmem:[#allocation7 + $0x58] sm:$0xff]   ;;  %v931_v27 = vld [vmem:[#allocation7 + $0x60] sm:$0xff]   ;;  %v933_v29 = vld [vmem:[#allocation7 + $0x68] sm:$0xff]   ;;  %v268_v37 = vsub.s32 0, %v267_v36  ;;  %v272_v39 = vsub.s32 1, %v267_v36  ;;  %s651_s10 = scalar_lea.sflag [#allocation4], %s1311_s5 }
  0x73   : > { %806 = vmatprep.subr.bf16.mxu1 %v925_v21  ;;  %v930_v26 = vld [vmem:[#allocation7 + $0x18] sm:$0xff]   ;;  %v932_v28 = vld [vmem:[#allocation7 + $0x20] sm:$0xff]   ;;  %v934_v30 = vld [vmem:[#allocation7 + $0x28] sm:$0xff]   ;;  %s1035_s21 = scalar_lea.vmem %s1353_s28, 128  ;;  %p1413_p0 = scmp.ne.s32.totalorder %s1408_s20, 0 }
  0x74   : > { %361 = vmatpush1.bf16.msra.mxu0 %v907_v6  ;;  %v935_v31 = vld [vmem:[#allocation7 + $0x70] sm:$0xff]   ;;  %v937_v33 = vld [vmem:[#allocation7 + $0x78] sm:$0xff]   ;;  %p1036_p11 = scmp.ne.s32.totalorder %s1353_s28, %s1035_s21  ;;  %s1116_s19 = smov [#allocation8]  }
  0x75   : > { %362 = vmatprep.subr.bf16.mxu0 %v908_v7  ;;  %v936_v32 = vld [vmem:[#allocation7 + $0x30] sm:$0xff]   ;;  %v938_v34 = vld [vmem:[#allocation7 + $0x38] sm:$0xff]   ;;  %s1039_s8 = sshll.u32 %s1116_s19, 4  ;;  %s1040_s8 = int_to_ptr.vmem [resolvable:$false] %s1039_s8 }
  0x76   : > { %807 = vmatpush3.bf16.msra.mxu1 %v926_v22  ;;  %v244_v38 = vld [vmem:[%s1398_s3] ss:$4 sm:$0x3]  ;;  %p1037_p1 = pnand %p1036_p11, %p1413_p0  ;;  %s1041_s23 = scalar_lea.vmem %s1040_s8, 256 }
  0x77   : > { %808 = vmatprep.subr.bf16.mxu1 %v927_v23  ;;  %v269_v40 = vrot.slane %v244_v38, %v268_v37  ;;  %v273_v41 = vrot.slane %v244_v38, %v272_v39  ;;  %v781_v39 = vld [vmem:[%s1398_s3 + $0x1] ss:$0 sm:$0xff]  ;;  %p1042_p5 = scmp.lt.s32.totalorder %s1353_s28, %s1040_s8  ;;  %p1043_p9 = scmp.lt.s32.totalorder %s1041_s23, %s1035_s21 }
  0x78   : > { %363 = vmatpush1.bf16.msra.mxu0 %v910_v8  ;;  %p1038_p3 = pneg %p1037_p1 }
  0x79   : > { %364 = vmatprep.subr.bf16.mxu0 %v911_v9  ;;  %p1044_p12 = por %p1043_p9, %p1042_p5 }
  0x7a   : > { %809 = vmatpush3.bf16.msra.mxu1 %v928_v24  ;;  %v1115_v24 = vmov -1.0  }
  0x7b   : > { %810 = vmatprep.subr.bf16.mxu1 %v929_v25  ;;  %p1045_p2 = pnand %p1044_p12, %p1038_p3 }
  0x7c   : > { %365 = vmatpush1.bf16.msra.mxu0 %v913_v10 }
  0x7d   : > { %366 = vmatprep.subr.bf16.mxu0 %v914_v11 }
  0x7e   : > { %811 = vmatpush3.bf16.msra.mxu1 %v930_v26 }
  0x7f   : > { %812 = vmatprep.subr.bf16.mxu1 %v931_v27 }
  0x80   : > { %367 = vmatpush1.bf16.msra.mxu0 %v916_v12 }
  0x81   : > { %368 = vmatprep.subr.bf16.mxu0 %v917_v13 }
  0x82   : > { %813 = vmatpush3.bf16.msra.mxu1 %v932_v28 }
  0x83   : > { %814 = vmatprep.subr.bf16.mxu1 %v933_v29 }
  0x84   : > { %369 = vmatpush1.bf16.msra.mxu0 %v919_v14 }
  0x85   : > { %370 = vmatprep.subr.bf16.mxu0 %v920_v15 }
  0x86   : > { %815 = vmatpush3.bf16.msra.mxu1 %v934_v30 }
  0x87   : > { %816 = vmatprep.subr.bf16.mxu1 %v935_v31 }
  0x88   : > { %371 = vmatpush1.bf16.msra.mxu0 %v922_v16 }
  0x8a   : > { %817 = vmatpush3.bf16.msra.mxu1 %v936_v32 }
  0x8b   : > { %389 = vmatmul.mubr.bf16.vlgmr.msra.gmra.mrb[0].mxu0 %v248_v18  ;;  %818 = vmatprep.subr.bf16.mxu1 %v937_v33 }
  0x8e   : > { %819 = vmatpush3.bf16.msra.mxu1 %v938_v34 }
 0x15e   : > { %v390_v42 = vpop.f32.mrb[0].mxu0 }
 0x15f   : > { %v391_v43 = vadd.f32 %v390_v42, %v269_v40  ;;  %v392_v44 = vpop.f32.mrb[1].mxu0 }
 0x160   : > { %v393_v45 = vadd.f32 %v392_v44, %v273_v41  ;;  %v394_v46 = vpop.f32.mrb[2].mxu0 }
 0x161   : > { %v399_v47 = vmul.f32 0.70710677, %v391_v43  ;;  %v395_v48 = vpop.f32.mrb[3].mxu0  ;;  %v397_v30 = vmul.f32 0.5, %v391_v43 }
 0x162   : > { %v400_v49 = vmul.f32 0.70710677, %v393_v45  ;;  %v398_v32 = vmul.f32 0.5, %v393_v45 }
 0x163   : > { %v405_v50 = vand.u32 2147483647, %v399_v47  ;;  %vm401_vm0 = vcmp.ge.f32.partialorder %v399_v47, 0.0 }
 0x164   : > { %v406_v51 = vand.u32 2147483647, %v400_v49  ;;  %vm402_vm1 = vcmp.ge.f32.partialorder %v400_v49, 0.0  ;;  %v403_v25 = vsel %vm401_vm0, 1.0, %v1115_v24 }
 0x165   : > { %v407_v52 = vmul.f32 0.3275911, %v405_v50  ;;  %v433_v56 = vsub.f32 0.0, %v405_v50  ;;  %v404_v27 = vsel %vm402_vm1, 1.0, %v1115_v24 }
 0x166   : > { %v408_v53 = vmul.f32 0.3275911, %v406_v51  ;;  %v434_v57 = vsub.f32 0.0, %v406_v51 }
 0x167   : > { %v409_v54 = vadd.f32 1.0, %v407_v52  ;;  %v435_v59 = vmul.f32 %v433_v56, %v405_v50 }
 0x168   : > { %v410_v55 = vadd.f32 1.0, %v408_v53  ;;  %v436_v61 = vmul.f32 %v434_v57, %v406_v51  ;;  %v799_v57 = vld [vmem:[%s1398_s3 + $0x3] ss:$0 sm:$0xff] }
 0x169   : > { %939 = vrcp.f32 %v409_v54  ;;  %v437_v1 = vmul.f32 1.442695, %v435_v59 }
 0x16a   : > { %941 = vrcp.f32 %v410_v55  ;;  %v439_v3 = vmul.f32 1.442695, %v436_v61 }
 0x16b   : > { %943 = vpow2.f32 %v437_v1 }
 0x16c   : > { %945 = vpow2.f32 %v439_v3 }
 0x173   : > { %v940_v58 = vpop.eup %939 }
 0x174   : > { %v942_v60 = vpop.eup %941  ;;  %v415_v62 = vmul.f32 1.0614054, %v940_v58 }
 0x175   : > { %v416_v63 = vmul.f32 1.0614054, %v942_v60  ;;  %v944_v18 = vpop.eup %943 }
 0x176   : > { %v417_v0 = vadd.f32 -1.4531521, %v415_v62  ;;  %v946_v20 = vpop.eup %945 }
 0x177   : > { %v418_v2 = vadd.f32 -1.4531521, %v416_v63 }
 0x178   : > { %v419_v4 = vmul.f32 %v940_v58, %v417_v0 }
 0x179   : > { %v420_v5 = vmul.f32 %v942_v60, %v418_v2 }
 0x17a   : > { %v421_v6 = vadd.f32 1.4214138, %v419_v4 }
 0x17b   : > { %v422_v7 = vadd.f32 1.4214138, %v420_v5 }
 0x17c   : > { %v423_v8 = vmul.f32 %v940_v58, %v421_v6 }
 0x17d   : > { %v424_v9 = vmul.f32 %v942_v60, %v422_v7 }
 0x17e   : > { %v425_v10 = vadd.f32 -0.28449672, %v423_v8 }
 0x17f   : > { %v426_v11 = vadd.f32 -0.28449672, %v424_v9 }
 0x180   : > { %v427_v12 = vmul.f32 %v940_v58, %v425_v10 }
 0x181   : > { %v428_v13 = vmul.f32 %v942_v60, %v426_v11 }
 0x182   : > { %v429_v14 = vadd.f32 0.2548296, %v427_v12 }
 0x183   : > { %v430_v15 = vadd.f32 0.2548296, %v428_v13 }
 0x184   : > { %v431_v16 = vmul.f32 %v940_v58, %v429_v14 }
 0x185   : > { %v432_v19 = vmul.f32 %v942_v60, %v430_v15 }
 0x186   : > { %v441_v21 = vmul.f32 %v944_v18, %v431_v16 }
 0x187   : > { %v442_v22 = vmul.f32 %v946_v20, %v432_v19 }
 0x188   : > { %v443_v23 = vsub.f32 1.0, %v441_v21 }
 0x189   : > { %v444_v26 = vsub.f32 1.0, %v442_v22 }
 0x18a   : > { %v445_v28 = vmul.f32 %v443_v23, %v403_v25 }
 0x18b   : > { %v446_v29 = vmul.f32 %v444_v26, %v404_v27 }
 0x18c   : > { %v447_v31 = vadd.f32 1.0, %v445_v28 }
 0x18d   : > { %v448_v33 = vadd.f32 1.0, %v446_v29 }
 0x18e   : > { %v449_v34 = vmul.f32 %v447_v31, %v397_v30 }
 0x18f   : > { %v450_v35 = vmul.f32 %v448_v33, %v398_v32 }
 0x190   : > { %v451_v37 = vpack.c.bf16 %v449_v34, %v449_v34 }
 0x191   : > { %v452_v36 = vpack.c.bf16 %v450_v35, %v450_v35 }
 0x193   : > { %617 = vmatprep.mubr.bf16.mxu1 %v452_v36 }
 0x194   : > { %618 = vmatmul.mubr.bf16.vlgmr.msra.gmra.mrb[0].mxu1 %v451_v37 }
 0x267   : > { %v820_v38 = vpop.f32.mrb[0].mxu1 }
 0x268   : > { %v821_v40 = vpop.f32.mrb[1].mxu1 }
 0x269   : > { %v822_v41 = vadd.f32 %v821_v40, %v820_v38  ;;  %v823_v42 = vpop.f32.mrb[2].mxu1 }
 0x26a   : > { %v824_v44 = vpop.f32.mrb[3].mxu1 }
 0x26b   : > { %v620_v46 = vadd.f32 %v822_v41, %v781_v39 }
 0x26d   : > { %v625_v43 = vadd.f32 %v620_v46, %v1328_v17  ;;  %v798_v17 = vld [vmem:[%s1398_s3 + $0x2] ss:$0 sm:$0xff] }
 0x26f   : > { %626 = vadd.xlane.f32.xlu0 %v625_v43  ;;  %v629_v45 = vmul.f32 %v625_v43, %v625_v43 }
 0x273   : > { %630 = vadd.xlane.f32.xlu0 %v629_v45 }
 0x2fc   : > { %v627_v47 = vpop.xlane.xlu0 %626 }
 0x2fd   : > { %v628_v48 = vmul.f32 0.0078125, %v627_v47 }
 0x2ff   : > { %v633_v50 = vmul.f32 %v628_v48, %v628_v48  ;;  %v635_v54 = vsub.f32 %v625_v43, %v628_v48 }
 0x300   : > { %v631_v49 = vpop.xlane.xlu0 %630 }
 0x301   : > { %v632_v51 = vmul.f32 0.0078125, %v631_v49 }
 0x303   : > { %v634_v52 = vsub.f32 %v632_v51, %v633_v50 }
 0x305   : > { %v636_v53 = vadd.f32 1e-12, %v634_v52 }
 0x307   : > { %947 = vrsqrt.f32 %v636_v53 }
 0x311   : > { %v948_v55 = vpop.eup %947 }
 0x312   : > { %v638_v56 = vmul.f32 %v948_v55, %v635_v54 }
 0x314   : > { %v643_v58 = vmul.f32 %v798_v17, %v638_v56 }
 0x316   : > { %v648_v59 = vadd.f32 %v799_v57, %v643_v58 }
 0x318   : > { %649 = vst [vmem:[%s241_s26] sm:$0xff] %v648_v59 }
 0x319   : > { %1048 = shalt.err (!%p1045_p2)
}
 0x31a   : > { %s1049_s5 = scalar_lea.hbm %s1351_s9, 128  ;;  %s1053_s25 = scalar_lea.hbm %s1399_s4, 256 }
 0x31b   : > { %p1050_p13 = scmp.ne.s32.totalorder %s1351_s9, %s1049_s5  ;;  %p1054_p4 = scmp.lt.u32.totalorder %s1351_s9, %s1399_s4 }
 0x31c   : > { %p1055_p7 = scmp.lt.u32.totalorder %s1053_s25, %s1049_s5  ;;  %p1057_p11 = scmp.lt.u32.totalorder %s1049_s5, %s1351_s9 }
 0x31d   : > { %p1051_p6 = pnand %p1050_p13, %p1413_p0 }
 0x31e   : > { %p1056_p8 = por %p1055_p7, %p1054_p4 }
 0x31f   : > { %p1052_p10 = pneg %p1051_p6 }
 0x320   : > { %p1058_p1 = por %p1057_p11, %p1056_p8 }
 0x322   : > { %p1059_p3 = pnand %p1058_p1, %p1052_p10 }
 0x324   : > { %1062 = shalt.err (!%p1059_p3)
}
 0x325   : > { %836 = dma.vmem_to_hbm [thread:$0]  (%p1413_p0), %s1353_s28, 128, %s1351_s9, %s651_s10  }
 0x326 PF: > { %s676_s13 = sand.u32 1, %s1093_s15   ;;  %p1414_p5 = scmp.ne.s32.totalorder %s1404_s22, 0 }
 0x327   : > { %p1415_p9 = scmp.ge.s32.totalorder %s1105_s18, 2  ;;  %s677_s24 = scalar_lea.sflag [#allocation4], %s676_s13 }
 0x329   : > { %p850_p12 = pnand %p1415_p9, %p1414_p5 }
 0x32b   : > { %1088 = dma.done.wait (!%p850_p12), %s677_s24, 128  }
 0x32c   : > { %1090 = vsyncadd (!%p850_p12), %s677_s24, 4294967168  ;;  %p18_p2 = scmp.ge.s32.totalorder %s1252_s11, 4   ;;  %s1416_s15 = smov %s1097_s16 }
 0x32d   : > { %s1417_s16 = smov %s1101_s17  ;;  %s1418_s17 = smov %s1261_s14 }
 0x32e   : > { %s1419_s18 = smov %s1252_s11  ;;  %20 = sbr.rel (!%p18_p2) target bundleno = 6 (0x6), region = 89 }
 0x335   :  { %682 = vsyncpa [#allocation3], 1 }
 0x336   :  { %684 = vsyncpa [#allocation3 + $0x1], 1 }
 0x337   :  { %685 = vsyncpa [#allocation6], 1 }
 0x338   :  { %686 = vsyncpa [#allocation4], 1 }
 0x339   :  { %688 = vsyncpa [#allocation4 + $0x1], 1 }

</bundles_post_ra>
